<compile_context>
chip_gen: v7x
topology: tpu7x:2x2x1
jax: 0.10.0
libtpu: 0.0.40
codegen_flags: <defaults>
</compile_context>

<pallas_src>
import functools

import jax
import jax.numpy as jnp
from jax.experimental import pallas as pl
from jax.experimental.pallas import tpu as pltpu

EPS = 1e-5  # nn.BatchNorm2d default eps
_VMEM_LIMIT = 32 * 1024 * 1024  # safe on v5e/v6e/v7x; kernel footprint is far smaller


# ----------------------------------------------------------------------------
# Shared per-tile math: x tile [C_in, T] (f32) -> (y, sc), each [out_c, T] (f32)
#   y  = down(relu(up(x)))        (1x1 convs == matmuls over the channel axis)
#   sc = shortcut_conv(x)
# ----------------------------------------------------------------------------
def _branch_outputs(x_f32, wup_ref, bup_ref, wdn_ref, bdn_ref, wsc_ref, bsc_ref):
    xb = x_f32.astype(jnp.bfloat16)                       # MXU-native input
    h = jnp.dot(wup_ref[...], xb, preferred_element_type=jnp.float32) + bup_ref[...]
    h = jnp.maximum(h, 0.0)                               # ReLU in f32
    y = jnp.dot(wdn_ref[...], h.astype(jnp.bfloat16),
                preferred_element_type=jnp.float32) + bdn_ref[...]
    sc = jnp.dot(wsc_ref[...], xb,
                 preferred_element_type=jnp.float32) + bsc_ref[...]
    return y, sc


# ----------------------------------------------------------------------------
# Pass 1: per-tile BatchNorm statistics (sum and centered sum-of-squares).
# Output block: [out_c, 8] -> columns: [sum_y, M2_y, sum_sc, M2_sc, 0, 0, 0, 0]
# ----------------------------------------------------------------------------
def _stats_kernel(x_ref, wup_ref, bup_ref, wdn_ref, bdn_ref, wsc_ref, bsc_ref,
                  stats_ref, *, hw, tile, needs_mask):
    t = pl.program_id(1)
    x = x_ref[...]                                        # [C_in, tile] f32

    if needs_mask:
        lane = jax.lax.broadcasted_iota(jnp.int32, (1, tile), 1)
        valid = (t * tile + lane) < hw                    # [1, tile] bool
        maskf = valid.astype(jnp.float32)
        x = jnp.where(valid, x, 0.0)                      # kill padded-read garbage
        n_valid = jnp.minimum(tile, hw - t * tile).astype(jnp.float32)
        inv_n = 1.0 / jnp.maximum(n_valid, 1.0)
    else:
        inv_n = jnp.float32(1.0 / tile)

    y, sc = _branch_outputs(x, wup_ref, bup_ref, wdn_ref, bdn_ref, wsc_ref, bsc_ref)

    def tile_stats(v):
        if needs_mask:
            s = jnp.sum(v * maskf, axis=-1, keepdims=True)        # [out_c, 1]
            m = s * inv_n
            m2 = jnp.sum(((v - m) ** 2) * maskf, axis=-1, keepdims=True)
        else:
            s = jnp.sum(v, axis=-1, keepdims=True)
            m = s * inv_n
            m2 = jnp.sum((v - m) ** 2, axis=-1, keepdims=True)
        return s, m2

    s_y, m2_y = tile_stats(y)
    s_sc, m2_sc = tile_stats(sc)
    pad = jnp.zeros((s_y.shape[0], 4), jnp.float32)
    stats_ref[...] = jnp.concatenate([s_y, m2_y, s_sc, m2_sc, pad], axis=1)


# ----------------------------------------------------------------------------
# Pass 2: recompute y/sc and apply folded BN scale+shift, fused residual add.
#   out = y*a1 + c1 + sc*a2 + c2
# ----------------------------------------------------------------------------
def _apply_kernel(x_ref, wup_ref, bup_ref, wdn_ref, bdn_ref, wsc_ref, bsc_ref,
                  a1_ref, c1_ref, a2_ref, c2_ref, o_ref):
    y, sc = _branch_outputs(x_ref[...], wup_ref, bup_ref, wdn_ref, bdn_ref,
                            wsc_ref, bsc_ref)
    o_ref[...] = y * a1_ref[...] + c1_ref[...] + sc * a2_ref[...] + c2_ref[...]


# ----------------------------------------------------------------------------
# Wrapper
# ----------------------------------------------------------------------------
def adapter_layer_forward(x, params, *, tile_m=1024):
    """x: [N, in_c, H, W] float32 (NCHW).  Returns [N, out_c, H, W] float32.

    BatchNorm uses batch statistics (matches PyTorch .train() forward).
    tile_m: pixels per tile; sweep 512-2048 for large feature maps.  It is clipped
    to a multiple of 128 (lane-dense stores) and to the spatial extent.
    """
    N, c_in, H, W = x.shape
    hw = H * W
    bott = params["w_up"].shape[0]
    out_c = params["w_down"].shape[0]

    # NCHW flattened to [N, C, H*W] is already channels-in-sublanes / pixels-in-lanes.
    x3 = x.reshape(N, c_in, hw)

    tile = min(tile_m, hw)
    if hw >= 128:
        tile = max(128, (tile // 128) * 128)
    num_t = (hw + tile - 1) // tile
    needs_mask = (hw % tile) != 0

    # bf16 weights (MXU inputs); biases / BN params in f32 as [C, 1] columns.
    wup = params["w_up"].astype(jnp.bfloat16)      # [bott, in_c]
    wdn = params["w_down"].astype(jnp.bfloat16)    # [out_c, bott]
    wsc = params["w_sc"].astype(jnp.bfloat16)      # [out_c, in_c]
    bup = params["b_up"].reshape(bott, 1).astype(jnp.float32)
    bdn = params["b_down"].reshape(out_c, 1).astype(jnp.float32)
    bsc = params["b_sc"].reshape(out_c, 1).astype(jnp.float32)

    x_spec = pl.BlockSpec((None, c_in, tile), lambda n, t: (n, 0, t))
    weight_specs = [
        pl.BlockSpec(wup.shape, lambda n, t: (0, 0)),
        pl.BlockSpec(bup.shape, lambda n, t: (0, 0)),
        pl.BlockSpec(wdn.shape, lambda n, t: (0, 0)),
        pl.BlockSpec(bdn.shape, lambda n, t: (0, 0)),
        pl.BlockSpec(wsc.shape, lambda n, t: (0, 0)),
        pl.BlockSpec(bsc.shape, lambda n, t: (0, 0)),
    ]
    compiler_params = pltpu.CompilerParams(
        dimension_semantics=("parallel", "parallel"),
        vmem_limit_bytes=_VMEM_LIMIT)
    flops = 2 * N * hw * (c_in * bott + bott * out_c + c_in * out_c)

    # -------- Pass 1: per-tile partial statistics --------
    stats = pl.pallas_call(
        functools.partial(_stats_kernel, hw=hw, tile=tile, needs_mask=needs_mask),
        out_shape=jax.ShapeDtypeStruct((N, num_t, out_c, 8), jnp.float32),
        grid_spec=pltpu.PrefetchScalarGridSpec(
            num_scalar_prefetch=0,
            grid=(N, num_t),
            in_specs=[x_spec] + weight_specs,
            out_specs=pl.BlockSpec((None, None, out_c, 8),
                                   lambda n, t: (n, t, 0, 0)),
        ),
        compiler_params=compiler_params,
        cost_estimate=pl.CostEstimate(
            flops=flops, transcendentals=0,
            bytes_accessed=x3.size * 4 + N * num_t * out_c * 8 * 4),
    )(x3, wup, bup, wdn, bdn, wsc, bsc)

    # -------- Combine partial stats (Chan-style, stable) and fold BN --------
    stats = stats.reshape(N * num_t, out_c, 8)
    counts = jnp.asarray([tile] * (num_t - 1) + [hw - (num_t - 1) * tile],
                         jnp.float32)
    counts = jnp.tile(counts, N)[:, None]                      # [N*num_t, 1]
    m_total = float(N * hw)

    def combine(s_col, m2_col):
        s = stats[:, :, s_col]                                 # [NT, out_c]
        m2 = stats[:, :, m2_col]
        mean = jnp.sum(s, axis=0) / m_total
        t_mean = s / counts
        var = (jnp.sum(m2, axis=0) +
               jnp.sum(counts * (t_mean - mean) ** 2, axis=0)) / m_total
        return mean, var

    mean_y, var_y = combine(0, 1)
    mean_sc, var_sc = combine(2, 3)

    a1f = params["gamma1"] * jax.lax.rsqrt(var_y + EPS)
    c1f = params["beta1"] - mean_y * a1f
    a2f = params["gamma2"] * jax.lax.rsqrt(var_sc + EPS)
    c2f = params["beta2"] - mean_sc * a2f
    a1 = a1f.reshape(out_c, 1).astype(jnp.float32)
    c1 = c1f.reshape(out_c, 1).astype(jnp.float32)
    a2 = a2f.reshape(out_c, 1).astype(jnp.float32)
    c2 = c2f.reshape(out_c, 1).astype(jnp.float32)
    bn_spec = pl.BlockSpec((out_c, 1), lambda n, t: (0, 0))

    # -------- Pass 2: apply --------
    out = pl.pallas_call(
        _apply_kernel,
        out_shape=jax.ShapeDtypeStruct((N, out_c, hw), jnp.float32),
        grid_spec=pltpu.PrefetchScalarGridSpec(
            num_scalar_prefetch=0,
            grid=(N, num_t),
            in_specs=[x_spec] + weight_specs + [bn_spec] * 4,
            out_specs=pl.BlockSpec((None, out_c, tile), lambda n, t: (n, 0, t)),
        ),
        compiler_params=compiler_params,
        cost_estimate=pl.CostEstimate(
            flops=flops, transcendentals=0,
            bytes_accessed=x3.size * 4 + N * out_c * hw * 4),
    )(x3, wup, bup, wdn, bdn, wsc, bsc, a1, c1, a2, c2)

    return out.reshape(N, out_c, H, W)


# ----------------------------------------------------------------------------
# Pure-JAX reference (same bf16-input / f32-accumulate math) for verification.
# ----------------------------------------------------------------------------
def adapter_layer_ref(x, p):
    N, c_in, H, W = x.shape
    xf = jnp.transpose(x, (0, 2, 3, 1)).reshape(-1, c_in)
    xb = xf.astype(jnp.bfloat16)
    wup = p["w_up"].astype(jnp.bfloat16)
    wdn = p["w_down"].astype(jnp.bfloat16)
    wsc = p["w_sc"].astype(jnp.bfloat16)

    h = jnp.dot(xb, wup.T, preferred_element_type=jnp.float32) + p["b_up"]
    h = jnp.maximum(h, 0.0)
    y = jnp.dot(h.astype(jnp.bfloat16), wdn.T,
                preferred_element_type=jnp.float32) + p["b_down"]
    sc = jnp.dot(xb, wsc.T, preferred_element_type=jnp.float32) + p["b_sc"]

    def bn(v, g, b):
        m = jnp.mean(v, axis=0)
        var = jnp.mean((v - m) ** 2, axis=0)    # biased variance (PyTorch forward)
        return (v - m) * jax.lax.rsqrt(var + EPS) * g + b

    out = bn(y, p["gamma1"], p["beta1"]) + bn(sc, p["gamma2"], p["beta2"])
    out_c = out.shape[-1]
    return jnp.transpose(out.reshape(N, H, W, out_c), (0, 3, 1, 2))


def init_params(key, in_c, out_c, bottleneck):
    ks = jax.random.split(key, 10)
    f32 = jnp.float32
    # Conv2d 1x1 weights stored as [C_out, C_in] (PyTorch [out, in, 1, 1] squeezed).
    return {
        "w_up":   0.1 * jax.random.normal(ks[0], (bottleneck, in_c), f32),
        "b_up":   0.1 * jax.random.normal(ks[1], (bottleneck,), f32),
        "w_down": 0.1 * jax.random.normal(ks[2], (out_c, bottleneck), f32),
        "b_down": 0.1 * jax.random.normal(ks[3], (out_c,), f32),
        "w_sc":   0.1 * jax.random.normal(ks[4], (out_c, in_c), f32),
        "b_sc":   0.1 * jax.random.normal(ks[5], (out_c,), f32),
        "gamma1": 1.0 + 0.1 * jax.random.normal(ks[6], (out_c,), f32),
        "beta1":  0.1 * jax.random.normal(ks[7], (out_c,), f32),
        "gamma2": 1.0 + 0.1 * jax.random.normal(ks[8], (out_c,), f32),
        "beta2":  0.1 * jax.random.normal(ks[9], (out_c,), f32),
    }
    # TODO(synk): AdapterLayer.self.conv exists in __init__ but is unused in forward;
    # intentionally not implemented.


if __name__ == "__main__":
    key = jax.random.PRNGKey(0)
    k_x, k_p = jax.random.split(key)

    N, in_c, out_c, bottleneck = 2, 16, 8, 8
    H = W = 16
    x = jax.random.normal(k_x, (N, in_c, H, W), jnp.float32)
    params = init_params(k_p, in_c, out_c, bottleneck)

    # tile_m=128 so the small demo exercises multiple pixel tiles (and the
    # cross-tile Chan statistics combine); production would use 512-2048.
    fwd = jax.jit(functools.partial(adapter_layer_forward, tile_m=128))
    out = jax.block_until_ready(fwd(x, params))
    assert out.shape == (N, out_c, H, W), out.shape

    ref = adapter_layer_ref(x, params)
    max_err = float(jnp.max(jnp.abs(out - ref)))
    assert jnp.allclose(out, ref, atol=1e-2, rtol=1e-2), max_err

    print("KERNEL_OK")
</pallas_src>

<mosaic_0001>
module attributes {stable_mosaic.version = 11 : i64} {
  func.func @_stats_kernel(%arg0: i32, %arg1: i32, %arg2: memref<1x16x128xf32, #tpu.memory_space<vmem>>, %arg3: memref<8x16xbf16, #tpu.memory_space<vmem>>, %arg4: memref<8x1xf32, #tpu.memory_space<vmem>>, %arg5: memref<8x8xbf16, #tpu.memory_space<vmem>>, %arg6: memref<8x1xf32, #tpu.memory_space<vmem>>, %arg7: memref<8x16xbf16, #tpu.memory_space<vmem>>, %arg8: memref<8x1xf32, #tpu.memory_space<vmem>>, %arg9: memref<1x1x8x8xf32, #tpu.memory_space<vmem>>) attributes {dimension_semantics = [#tpu.dimension_semantics<parallel>, #tpu.dimension_semantics<parallel>], iteration_bounds = array<i64: 2, 2>, scalar_prefetch = 0 : i64, scratch_operands = 0 : i64, tpu.core_type = #tpu.core_type<tc>, window_params = [{transform_indices = @transform_0, window_bounds = array<i64: 1, 16, 128>}, {pipeline_mode = #tpu.pipeline_mode<synchronous>, transform_indices = @transform_1, window_bounds = array<i64: 8, 16>}, {pipeline_mode = #tpu.pipeline_mode<synchronous>, transform_indices = @transform_2, window_bounds = array<i64: 8, 1>}, {pipeline_mode = #tpu.pipeline_mode<synchronous>, transform_indices = @transform_3, window_bounds = array<i64: 8, 8>}, {pipeline_mode = #tpu.pipeline_mode<synchronous>, transform_indices = @transform_4, window_bounds = array<i64: 8, 1>}, {pipeline_mode = #tpu.pipeline_mode<synchronous>, transform_indices = @transform_5, window_bounds = array<i64: 8, 16>}, {pipeline_mode = #tpu.pipeline_mode<synchronous>, transform_indices = @transform_6, window_bounds = array<i64: 8, 1>}, {transform_indices = @transform_7, window_bounds = array<i64: 1, 1, 8, 8>}]} {
    %c0 = arith.constant 0 : index
    %c0_0 = arith.constant 0 : index
    %c0_1 = arith.constant 0 : index
    %0 = vector.load %arg2[%c0, %c0_0, %c0_1] : memref<1x16x128xf32, #tpu.memory_space<vmem>>, vector<1x16x128xf32>
    %1 = vector.shape_cast %0 : vector<1x16x128xf32> to vector<16x128xf32>
    %2 = arith.truncf %1 : vector<16x128xf32> to vector<16x128xbf16>
    %c0_2 = arith.constant 0 : index
    %c0_3 = arith.constant 0 : index
    %3 = vector.load %arg3[%c0_2, %c0_3] : memref<8x16xbf16, #tpu.memory_space<vmem>>, vector<8x16xbf16>
    %cst = arith.constant dense<0.000000e+00> : vector<8x128xf32>
    %4 = tpu.matmul %3, %2, %cst {dimension_numbers = #tpu.dot_dimension_numbers<[1], [0], [0], [1], [0, 0, 1, 1], [], []>} : vector<8x16xbf16>, vector<16x128xbf16>, vector<8x128xf32> -> vector<8x128xf32>
    %c0_4 = arith.constant 0 : index
    %c0_5 = arith.constant 0 : index
    %5 = vector.load %arg4[%c0_4, %c0_5] : memref<8x1xf32, #tpu.memory_space<vmem>>, vector<8x1xf32>
    %6 = vector.broadcast %5 : vector<8x1xf32> to vector<8x128xf32>
    %7 = arith.addf %4, %6 : vector<8x128xf32>
    %cst_6 = arith.constant 0.000000e+00 : f32
    %8 = vector.broadcast %cst_6 : f32 to vector<8x128xf32>
    %9 = arith.maximumf %7, %8 : vector<8x128xf32>
    %c0_7 = arith.constant 0 : index
    %c0_8 = arith.constant 0 : index
    %10 = vector.load %arg5[%c0_7, %c0_8] : memref<8x8xbf16, #tpu.memory_space<vmem>>, vector<8x8xbf16>
    %11 = arith.truncf %9 : vector<8x128xf32> to vector<8x128xbf16>
    %cst_9 = arith.constant dense<0.000000e+00> : vector<8x128xf32>
    %12 = tpu.matmul %10, %11, %cst_9 {dimension_numbers = #tpu.dot_dimension_numbers<[1], [0], [0], [1], [0, 0, 1, 1], [], []>} : vector<8x8xbf16>, vector<8x128xbf16>, vector<8x128xf32> -> vector<8x128xf32>
    %c0_10 = arith.constant 0 : index
    %c0_11 = arith.constant 0 : index
    %13 = vector.load %arg6[%c0_10, %c0_11] : memref<8x1xf32, #tpu.memory_space<vmem>>, vector<8x1xf32>
    %14 = vector.broadcast %13 : vector<8x1xf32> to vector<8x128xf32>
    %15 = arith.addf %12, %14 : vector<8x128xf32>
    %c0_12 = arith.constant 0 : index
    %c0_13 = arith.constant 0 : index
    %16 = vector.load %arg7[%c0_12, %c0_13] : memref<8x16xbf16, #tpu.memory_space<vmem>>, vector<8x16xbf16>
    %cst_14 = arith.constant dense<0.000000e+00> : vector<8x128xf32>
    %17 = tpu.matmul %16, %2, %cst_14 {dimension_numbers = #tpu.dot_dimension_numbers<[1], [0], [0], [1], [0, 0, 1, 1], [], []>} : vector<8x16xbf16>, vector<16x128xbf16>, vector<8x128xf32> -> vector<8x128xf32>
    %c0_15 = arith.constant 0 : index
    %c0_16 = arith.constant 0 : index
    %18 = vector.load %arg8[%c0_15, %c0_16] : memref<8x1xf32, #tpu.memory_space<vmem>>, vector<8x1xf32>
    %19 = vector.broadcast %18 : vector<8x1xf32> to vector<8x128xf32>
    %20 = arith.addf %17, %19 : vector<8x128xf32>
    %cst_17 = arith.constant dense<0.000000e+00> : vector<8xf32>
    %21 = vector.multi_reduction <add>, %15, %cst_17 [1] : vector<8x128xf32> to vector<8xf32>
    %22 = vector.shape_cast %21 : vector<8xf32> to vector<8x1xf32>
    %cst_18 = arith.constant 7.812500e-03 : f32
    %23 = vector.broadcast %cst_18 : f32 to vector<8x1xf32>
    %24 = arith.mulf %22, %23 : vector<8x1xf32>
    %25 = vector.broadcast %24 : vector<8x1xf32> to vector<8x128xf32>
    %26 = arith.subf %15, %25 : vector<8x128xf32>
    %27 = arith.mulf %26, %26 : vector<8x128xf32>
    %cst_19 = arith.constant dense<0.000000e+00> : vector<8xf32>
    %28 = vector.multi_reduction <add>, %27, %cst_19 [1] : vector<8x128xf32> to vector<8xf32>
    %29 = vector.shape_cast %28 : vector<8xf32> to vector<8x1xf32>
    %cst_20 = arith.constant dense<0.000000e+00> : vector<8xf32>
    %30 = vector.multi_reduction <add>, %20, %cst_20 [1] : vector<8x128xf32> to vector<8xf32>
    %31 = vector.shape_cast %30 : vector<8xf32> to vector<8x1xf32>
    %cst_21 = arith.constant 7.812500e-03 : f32
    %32 = vector.broadcast %cst_21 : f32 to vector<8x1xf32>
    %33 = arith.mulf %31, %32 : vector<8x1xf32>
    %34 = vector.broadcast %33 : vector<8x1xf32> to vector<8x128xf32>
    %35 = arith.subf %20, %34 : vector<8x128xf32>
    %36 = arith.mulf %35, %35 : vector<8x128xf32>
    %cst_22 = arith.constant dense<0.000000e+00> : vector<8xf32>
    %37 = vector.multi_reduction <add>, %36, %cst_22 [1] : vector<8x128xf32> to vector<8xf32>
    %38 = vector.shape_cast %37 : vector<8xf32> to vector<8x1xf32>
    %cst_23 = arith.constant 0.000000e+00 : f32
    %39 = vector.broadcast %cst_23 : f32 to vector<8x4xf32>
    %40 = tpu.concatenate %22, %29, %31, %38, %39 in 1 : vector<8x1xf32>, vector<8x1xf32>, vector<8x1xf32>, vector<8x1xf32>, vector<8x4xf32> -> vector<8x8xf32>
    %c0_24 = arith.constant 0 : index
    %c0_25 = arith.constant 0 : index
    %c0_26 = arith.constant 0 : index
    %c0_27 = arith.constant 0 : index
    %41 = vector.load %arg9[%c0_24, %c0_25, %c0_26, %c0_27] : memref<1x1x8x8xf32, #tpu.memory_space<vmem>>, vector<1x1x8x8xf32>
    %42 = vector.shape_cast %41 : vector<1x1x8x8xf32> to vector<8x8xf32>
    %43 = vector.shape_cast %40 : vector<8x8xf32> to vector<1x1x8x8xf32>
    tpu.vector_store %arg9[%c0_24, %c0_25, %c0_26, %c0_27], %43 {strides = array<i32>} : memref<1x1x8x8xf32, #tpu.memory_space<vmem>>, vector<1x1x8x8xf32>,
    return
  }
  func.func @transform_0(%arg0: i32, %arg1: i32) -> (i32, i32, i32) {
    %c0_i32 = arith.constant 0 : i32
    %c0_i32_0 = arith.constant 0 : i32
    return %arg0, %c0_i32, %arg1 : i32, i32, i32
  }
  func.func @transform_1(%arg0: i32, %arg1: i32) -> (i32, i32) {
    %c0_i32 = arith.constant 0 : i32
    %c0_i32_0 = arith.constant 0 : i32
    %c0_i32_1 = arith.constant 0 : i32
    return %c0_i32, %c0_i32_0 : i32, i32
  }
  func.func @transform_2(%arg0: i32, %arg1: i32) -> (i32, i32) {
    %c0_i32 = arith.constant 0 : i32
    %c0_i32_0 = arith.constant 0 : i32
    %c0_i32_1 = arith.constant 0 : i32
    return %c0_i32, %c0_i32_0 : i32, i32
  }
  func.func @transform_3(%arg0: i32, %arg1: i32) -> (i32, i32) {
    %c0_i32 = arith.constant 0 : i32
    %c0_i32_0 = arith.constant 0 : i32
    %c0_i32_1 = arith.constant 0 : i32
    return %c0_i32, %c0_i32_0 : i32, i32
  }
  func.func @transform_4(%arg0: i32, %arg1: i32) -> (i32, i32) {
    %c0_i32 = arith.constant 0 : i32
    %c0_i32_0 = arith.constant 0 : i32
    %c0_i32_1 = arith.constant 0 : i32
    return %c0_i32, %c0_i32_0 : i32, i32
  }
  func.func @transform_5(%arg0: i32, %arg1: i32) -> (i32, i32) {
    %c0_i32 = arith.constant 0 : i32
    %c0_i32_0 = arith.constant 0 : i32
    %c0_i32_1 = arith.constant 0 : i32
    return %c0_i32, %c0_i32_0 : i32, i32
  }
  func.func @transform_6(%arg0: i32, %arg1: i32) -> (i32, i32) {
    %c0_i32 = arith.constant 0 : i32
    %c0_i32_0 = arith.constant 0 : i32
    %c0_i32_1 = arith.constant 0 : i32
    return %c0_i32, %c0_i32_0 : i32, i32
  }
  func.func @transform_7(%arg0: i32, %arg1: i32) -> (i32, i32, i32, i32) {
    %c0_i32 = arith.constant 0 : i32
    %c0_i32_0 = arith.constant 0 : i32
    %c0_i32_1 = arith.constant 0 : i32
    return %arg0, %arg1, %c0_i32, %c0_i32_0 : i32, i32, i32, i32
  }
}

module attributes {stable_mosaic.version = 11 : i64} {
  func.func @_apply_kernel(%arg0: i32, %arg1: i32, %arg2: memref<1x16x128xf32, #tpu.memory_space<vmem>>, %arg3: memref<8x16xbf16, #tpu.memory_space<vmem>>, %arg4: memref<8x1xf32, #tpu.memory_space<vmem>>, %arg5: memref<8x8xbf16, #tpu.memory_space<vmem>>, %arg6: memref<8x1xf32, #tpu.memory_space<vmem>>, %arg7: memref<8x16xbf16, #tpu.memory_space<vmem>>, %arg8: memref<8x1xf32, #tpu.memory_space<vmem>>, %arg9: memref<8x1xf32, #tpu.memory_space<vmem>>, %arg10: memref<8x1xf32, #tpu.memory_space<vmem>>, %arg11: memref<8x1xf32, #tpu.memory_space<vmem>>, %arg12: memref<8x1xf32, #tpu.memory_space<vmem>>, %arg13: memref<1x8x128xf32, #tpu.memory_space<vmem>>) attributes {dimension_semantics = [#tpu.dimension_semantics<parallel>, #tpu.dimension_semantics<parallel>], iteration_bounds = array<i64: 2, 2>, scalar_prefetch = 0 : i64, scratch_operands = 0 : i64, tpu.core_type = #tpu.core_type<tc>, window_params = [{transform_indices = @transform_0, window_bounds = array<i64: 1, 16, 128>}, {pipeline_mode = #tpu.pipeline_mode<synchronous>, transform_indices = @transform_1, window_bounds = array<i64: 8, 16>}, {pipeline_mode = #tpu.pipeline_mode<synchronous>, transform_indices = @transform_2, window_bounds = array<i64: 8, 1>}, {pipeline_mode = #tpu.pipeline_mode<synchronous>, transform_indices = @transform_3, window_bounds = array<i64: 8, 8>}, {pipeline_mode = #tpu.pipeline_mode<synchronous>, transform_indices = @transform_4, window_bounds = array<i64: 8, 1>}, {pipeline_mode = #tpu.pipeline_mode<synchronous>, transform_indices = @transform_5, window_bounds = array<i64: 8, 16>}, {pipeline_mode = #tpu.pipeline_mode<synchronous>, transform_indices = @transform_6, window_bounds = array<i64: 8, 1>}, {pipeline_mode = #tpu.pipeline_mode<synchronous>, transform_indices = @transform_7, window_bounds = array<i64: 8, 1>}, {pipeline_mode = #tpu.pipeline_mode<synchronous>, transform_indices = @transform_8, window_bounds = array<i64: 8, 1>}, {pipeline_mode = #tpu.pipeline_mode<synchronous>, transform_indices = @transform_9, window_bounds = array<i64: 8, 1>}, {pipeline_mode = #tpu.pipeline_mode<synchronous>, transform_indices = @transform_10, window_bounds = array<i64: 8, 1>}, {transform_indices = @transform_11, window_bounds = array<i64: 1, 8, 128>}]} {
    %c0 = arith.constant 0 : index
    %c0_0 = arith.constant 0 : index
    %c0_1 = arith.constant 0 : index
    %0 = vector.load %arg2[%c0, %c0_0, %c0_1] : memref<1x16x128xf32, #tpu.memory_space<vmem>>, vector<1x16x128xf32>
    %1 = vector.shape_cast %0 : vector<1x16x128xf32> to vector<16x128xf32>
    %2 = arith.truncf %1 : vector<16x128xf32> to vector<16x128xbf16>
    %c0_2 = arith.constant 0 : index
    %c0_3 = arith.constant 0 : index
    %3 = vector.load %arg3[%c0_2, %c0_3] : memref<8x16xbf16, #tpu.memory_space<vmem>>, vector<8x16xbf16>
    %cst = arith.constant dense<0.000000e+00> : vector<8x128xf32>
    %4 = tpu.matmul %3, %2, %cst {dimension_numbers = #tpu.dot_dimension_numbers<[1], [0], [0], [1], [0, 0, 1, 1], [], []>} : vector<8x16xbf16>, vector<16x128xbf16>, vector<8x128xf32> -> vector<8x128xf32>
    %c0_4 = arith.constant 0 : index
    %c0_5 = arith.constant 0 : index
    %5 = vector.load %arg4[%c0_4, %c0_5] : memref<8x1xf32, #tpu.memory_space<vmem>>, vector<8x1xf32>
    %6 = vector.broadcast %5 : vector<8x1xf32> to vector<8x128xf32>
    %7 = arith.addf %4, %6 : vector<8x128xf32>
    %cst_6 = arith.constant 0.000000e+00 : f32
    %8 = vector.broadcast %cst_6 : f32 to vector<8x128xf32>
    %9 = arith.maximumf %7, %8 : vector<8x128xf32>
    %c0_7 = arith.constant 0 : index
    %c0_8 = arith.constant 0 : index
    %10 = vector.load %arg5[%c0_7, %c0_8] : memref<8x8xbf16, #tpu.memory_space<vmem>>, vector<8x8xbf16>
    %11 = arith.truncf %9 : vector<8x128xf32> to vector<8x128xbf16>
    %cst_9 = arith.constant dense<0.000000e+00> : vector<8x128xf32>
    %12 = tpu.matmul %10, %11, %cst_9 {dimension_numbers = #tpu.dot_dimension_numbers<[1], [0], [0], [1], [0, 0, 1, 1], [], []>} : vector<8x8xbf16>, vector<8x128xbf16>, vector<8x128xf32> -> vector<8x128xf32>
    %c0_10 = arith.constant 0 : index
    %c0_11 = arith.constant 0 : index
    %13 = vector.load %arg6[%c0_10, %c0_11] : memref<8x1xf32, #tpu.memory_space<vmem>>, vector<8x1xf32>
    %14 = vector.broadcast %13 : vector<8x1xf32> to vector<8x128xf32>
    %15 = arith.addf %12, %14 : vector<8x128xf32>
    %c0_12 = arith.constant 0 : index
    %c0_13 = arith.constant 0 : index
    %16 = vector.load %arg7[%c0_12, %c0_13] : memref<8x16xbf16, #tpu.memory_space<vmem>>, vector<8x16xbf16>
    %cst_14 = arith.constant dense<0.000000e+00> : vector<8x128xf32>
    %17 = tpu.matmul %16, %2, %cst_14 {dimension_numbers = #tpu.dot_dimension_numbers<[1], [0], [0], [1], [0, 0, 1, 1], [], []>} : vector<8x16xbf16>, vector<16x128xbf16>, vector<8x128xf32> -> vector<8x128xf32>
    %c0_15 = arith.constant 0 : index
    %c0_16 = arith.constant 0 : index
    %18 = vector.load %arg8[%c0_15, %c0_16] : memref<8x1xf32, #tpu.memory_space<vmem>>, vector<8x1xf32>
    %19 = vector.broadcast %18 : vector<8x1xf32> to vector<8x128xf32>
    %20 = arith.addf %17, %19 : vector<8x128xf32>
    %c0_17 = arith.constant 0 : index
    %c0_18 = arith.constant 0 : index
    %21 = vector.load %arg9[%c0_17, %c0_18] : memref<8x1xf32, #tpu.memory_space<vmem>>, vector<8x1xf32>
    %22 = vector.broadcast %21 : vector<8x1xf32> to vector<8x128xf32>
    %23 = arith.mulf %15, %22 : vector<8x128xf32>
    %c0_19 = arith.constant 0 : index
    %c0_20 = arith.constant 0 : index
    %24 = vector.load %arg10[%c0_19, %c0_20] : memref<8x1xf32, #tpu.memory_space<vmem>>, vector<8x1xf32>
    %25 = vector.broadcast %24 : vector<8x1xf32> to vector<8x128xf32>
    %26 = arith.addf %23, %25 : vector<8x128xf32>
    %c0_21 = arith.constant 0 : index
    %c0_22 = arith.constant 0 : index
    %27 = vector.load %arg11[%c0_21, %c0_22] : memref<8x1xf32, #tpu.memory_space<vmem>>, vector<8x1xf32>
    %28 = vector.broadcast %27 : vector<8x1xf32> to vector<8x128xf32>
    %29 = arith.mulf %20, %28 : vector<8x128xf32>
    %30 = arith.addf %26, %29 : vector<8x128xf32>
    %c0_23 = arith.constant 0 : index
    %c0_24 = arith.constant 0 : index
    %31 = vector.load %arg12[%c0_23, %c0_24] : memref<8x1xf32, #tpu.memory_space<vmem>>, vector<8x1xf32>
    %32 = vector.broadcast %31 : vector<8x1xf32> to vector<8x128xf32>
    %33 = arith.addf %30, %32 : vector<8x128xf32>
    %c0_25 = arith.constant 0 : index
    %c0_26 = arith.constant 0 : index
    %c0_27 = arith.constant 0 : index
    %34 = vector.load %arg13[%c0_25, %c0_26, %c0_27] : memref<1x8x128xf32, #tpu.memory_space<vmem>>, vector<1x8x128xf32>
    %35 = vector.shape_cast %34 : vector<1x8x128xf32> to vector<8x128xf32>
    %36 = vector.shape_cast %33 : vector<8x128xf32> to vector<1x8x128xf32>
    tpu.vector_store %arg13[%c0_25, %c0_26, %c0_27], %36 {strides = array<i32>} : memref<1x8x128xf32, #tpu.memory_space<vmem>>, vector<1x8x128xf32>,
    return
  }
  func.func @transform_0(%arg0: i32, %arg1: i32) -> (i32, i32, i32) {
    %c0_i32 = arith.constant 0 : i32
    %c0_i32_0 = arith.constant 0 : i32
    return %arg0, %c0_i32, %arg1 : i32, i32, i32
  }
  func.func @transform_1(%arg0: i32, %arg1: i32) -> (i32, i32) {
    %c0_i32 = arith.constant 0 : i32
    %c0_i32_0 = arith.constant 0 : i32
    %c0_i32_1 = arith.constant 0 : i32
    return %c0_i32, %c0_i32_0 : i32, i32
  }
  func.func @transform_2(%arg0: i32, %arg1: i32) -> (i32, i32) {
    %c0_i32 = arith.constant 0 : i32
    %c0_i32_0 = arith.constant 0 : i32
    %c0_i32_1 = arith.constant 0 : i32
    return %c0_i32, %c0_i32_0 : i32, i32
  }
  func.func @transform_3(%arg0: i32, %arg1: i32) -> (i32, i32) {
    %c0_i32 = arith.constant 0 : i32
    %c0_i32_0 = arith.constant 0 : i32
    %c0_i32_1 = arith.constant 0 : i32
    return %c0_i32, %c0_i32_0 : i32, i32
  }
  func.func @transform_4(%arg0: i32, %arg1: i32) -> (i32, i32) {
    %c0_i32 = arith.constant 0 : i32
    %c0_i32_0 = arith.constant 0 : i32
    %c0_i32_1 = arith.constant 0 : i32
    return %c0_i32, %c0_i32_0 : i32, i32
  }
  func.func @transform_5(%arg0: i32, %arg1: i32) -> (i32, i32) {
    %c0_i32 = arith.constant 0 : i32
    %c0_i32_0 = arith.constant 0 : i32
    %c0_i32_1 = arith.constant 0 : i32
    return %c0_i32, %c0_i32_0 : i32, i32
  }
  func.func @transform_6(%arg0: i32, %arg1: i32) -> (i32, i32) {
    %c0_i32 = arith.constant 0 : i32
    %c0_i32_0 = arith.constant 0 : i32
    %c0_i32_1 = arith.constant 0 : i32
    return %c0_i32, %c0_i32_0 : i32, i32
  }
  func.func @transform_7(%arg0: i32, %arg1: i32) -> (i32, i32) {
    %c0_i32 = arith.constant 0 : i32
    %c0_i32_0 = arith.constant 0 : i32
    %c0_i32_1 = arith.constant 0 : i32
    return %c0_i32, %c0_i32_0 : i32, i32
  }
  func.func @transform_8(%arg0: i32, %arg1: i32) -> (i32, i32) {
    %c0_i32 = arith.constant 0 : i32
    %c0_i32_0 = arith.constant 0 : i32
    %c0_i32_1 = arith.constant 0 : i32
    return %c0_i32, %c0_i32_0 : i32, i32
  }
  func.func @transform_9(%arg0: i32, %arg1: i32) -> (i32, i32) {
    %c0_i32 = arith.constant 0 : i32
    %c0_i32_0 = arith.constant 0 : i32
    %c0_i32_1 = arith.constant 0 : i32
    return %c0_i32, %c0_i32_0 : i32, i32
  }
  func.func @transform_10(%arg0: i32, %arg1: i32) -> (i32, i32) {
    %c0_i32 = arith.constant 0 : i32
    %c0_i32_0 = arith.constant 0 : i32
    %c0_i32_1 = arith.constant 0 : i32
    return %c0_i32, %c0_i32_0 : i32, i32
  }
  func.func @transform_11(%arg0: i32, %arg1: i32) -> (i32, i32, i32) {
    %c0_i32 = arith.constant 0 : i32
    %c0_i32_0 = arith.constant 0 : i32
    return %arg0, %c0_i32, %arg1 : i32, i32, i32
  }
}

</mosaic_0001>

<bundles_post_ra>
// kernel: adapter_layer_forward.2
= control target key start
LH: loop header
LB: loop body
LE: loop exit
PB: predicated region body
PF: predicated region fallthrough
CT: control target
= control target key end

     0   :  { %s814_s24 = smov 0   ;;  %s816_s25 = smov 0   ;;  %s928_s0 = inlined_call_operand.vmem [shape: f32[2,16,256], index: 0, kind: input, shape index: {}]   ;;  %s929_s1 = inlined_call_operand.vmem [shape: bf16[8,16], index: 1, kind: input, shape index: {}]   ;;  %s930_s2 = inlined_call_operand.vmem [shape: f32[8,1], index: 2, kind: input, shape index: {}]   ;;  %s931_s3 = inlined_call_operand.vmem [shape: bf16[8,8], index: 3, kind: input, shape index: {}]   ;;  %s932_s4 = inlined_call_operand.vmem [shape: f32[8,1], index: 4, kind: input, shape index: {}]   ;;  %s933_s5 = inlined_call_operand.vmem [shape: bf16[8,16], index: 5, kind: input, shape index: {}]   ;;  %s934_s6 = inlined_call_operand.vmem [shape: f32[8,1], index: 6, kind: input, shape index: {}]   ;;  %s935_s7 = inlined_call_operand.vmem [shape: f32[2,2,8,8], index: 7, kind: output, shape index: {}]  }
   0x1   :  { %s818_s26 = smov 0   ;;  %s820_s27 = smov 0  }
   0x2   :  { %s822_s28 = smov 0   ;;  %s824_s29 = smov 0  }
   0x3   :  { %s826_s30 = smov 0  }
   0x4 LB: > { %s26_s8 = sadd.s32 1, %s761_s28  ;;  %s29_s9 = sadd.s32 1, %s765_s29  ;;  %s769_s30 = sphi %s826_s30, %s17_s30   ;;  %s765_s29 = sphi %s824_s29, %s941_s29   ;;  %s761_s28 = sphi %s822_s28, %s940_s28   ;;  %s757_s27 = sphi %s820_s27, %s939_s27   ;;  %s753_s26 = sphi %s818_s26, %s938_s26   ;;  %s749_s25 = sphi %s816_s25, %s937_s25   ;;  %s745_s24 = sphi %s814_s24, %s936_s24  }
   0x5   : > { %p27_p0 = scmp.ge.s32.totalorder %s26_s8, 2  ;;  %p45_p1 = scmp.ne.s32.totalorder %s749_s25, %s745_s24 }
   0x6   : > { %p46_p2 = scmp.eq.s32.totalorder %s769_s30, 0  ;;  %s38_s13 = sadd.s32 1, %s749_s25 }
   0x7   : > { %s943_s8 = smov (%p27_p0, %s26_s8), 0  ;;  %s945_s9 = smov (!%p27_p0, %s29_s9), %s765_s29 }
   0x8   : > { %p47_p3 = por %p46_p2, %p45_p1  ;;  %p31_p4 = scmp.ge.s32.totalorder %s945_s9, 2 }
   0x9   : > { %s34_s10 = ssub.s32 %s761_s28, %s943_s8  ;;  %p617_p6 = scmp.ge.s32.totalorder %s769_s30, 4 }
   0xa   : > { %s947_s9 = smov (%p31_p4, %s945_s9), 0 }
   0xb   : > { %s33_s11 = ssub.s32 %s765_s29, %s947_s9  ;;  %243 = sbr.rel (%p617_p6) target bundleno = 25 (0x19), region = 40 }
   0xc   : > { %s35_s12 = sor.u32 %s34_s10, %s33_s11 }
   0xd   : > { %p36_p5 = scmp.eq.s32.totalorder %s35_s12, 0 }
   0xf   : > { %s865_s14 = scalar_select %p36_p5, %s749_s25, %s38_s13  }
  0x12   : > { %246 = sbr.rel (!%p47_p3) target bundleno = 25 (0x19), region = 44  ;;  %s248_s15 = sand.u32 (%p47_p3), 1, %s749_s25  }
  0x13   : > { %s619_s16 = sshll.u32 (%p47_p3), %s765_s29, 2  ;;  %s618_s17 = sshll.u32 (%p47_p3), %s248_s15, 4 }
  0x14   : > { %s252_s18 = sadd.s32 (%p47_p3), %s761_s28, %s619_s16  ;;  %s250_s23 = scalar_lea.vmem (%p47_p3), [#allocation2], %s618_s17 }
  0x15   : > { %s620_s19 = sshll.u32 (%p47_p3), %s252_s18, 3 }
  0x16   : > { %s254_s22 = scalar_lea.vmem (%p47_p3), %s928_s0, %s620_s19 }
  0x17   : > { %v284_v0 = vld [vmem:[%s254_s22] sm:$0xff] (%p47_p3)  ;;  %v286_v1 = vld [vmem:[%s254_s22 + $0x10] sm:$0xff] (%p47_p3) }
  0x18   : > { %285 = vst [vmem:[%s250_s23] sm:$0xff] (%p47_p3), %v284_v0  ;;  %287 = vst [vmem:[%s250_s23 + $0x8] sm:$0xff] (%p47_p3), %v286_v1 }
  0x19 PF: > { %p621_p7 = scmp.ge.s32.totalorder %s769_s30, 1  ;;  %p292_p8 = scmp.lt.s32.totalorder %s769_s30, 5 }
  0x1b   : > { %p293_p9 = pnand %p621_p7, %p292_p8 }
  0x1c   : > { %s299_s10 = sand.u32 (!%p293_p9), 1, %s745_s24   ;;  %v771_v2 = vmov (!%p293_p9), 0.0   ;;  %vm772_vm0 = vmmov (!%p293_p9), 0   ;;  %v346_v3 = vld [vmem:[%s930_s2] sm:$0xff] (!%p293_p9)  ;;  %v773_v4 = vmov (!%p293_p9), 0   ;;  %vm352_vm1 = vcmask (!%p293_p9), 130048  }
  0x1d   : > { %296 = sbr.rel (%p293_p9) target bundleno = 768 (0x300), region = 82  ;;  %636 = vmatprep.subr.bf16.mxu0 (!%p293_p9), %v771_v2  ;;  %s622_s11 = sshll.u32 (!%p293_p9), %s299_s10, 4  ;;  %638 = vmatprep.mubr.msk.bf16.mxu0 (!%p293_p9), %vm772_vm0, %v771_v2  ;;  %v454_v5 = vld [vmem:[%s934_s6] sm:$0xff] (!%p293_p9)  ;;  %vm409_vm2 = vcmask (!%p293_p9), 1043456   ;;  %vm405_vm3 = vcmask (!%p293_p9), 64512   ;;  %vm517_vm4 = vcmask (!%p293_p9), 7168  }
  0x1e   : > { %713 = vset.pattern.permute.xlu0 (!%p293_p9), %v773_v4  ;;  %714 = vset.pattern.permute.xlu1 (!%p293_p9), %v773_v4  ;;  %s301_s17 = scalar_lea.vmem (!%p293_p9), [#allocation2], %s622_s11  ;;  %v399_v9 = vld [vmem:[%s932_s4] sm:$0xff] (!%p293_p9)  ;;  %p333_p10 = scmp.lt.s32.totalorder (!%p293_p9), %s757_s27, 1  ;;  %vm519_vm5 = vcmask (!%p293_p9), 15360   ;;  %vm521_vm6 = vcmask (!%p293_p9), 23552   ;;  %vm523_vm7 = vcmask (!%p293_p9), 31744  }
  0x1f   : > { %v342_v6 = vld [vmem:[%s301_s17] sm:$0xff] (!%p293_p9)  ;;  %v343_v7 = vld [vmem:[%s301_s17 + $0x8] sm:$0xff] (!%p293_p9)  ;;  %349 = vperm.xlu0 (!%p293_p9), %713, %v346_v3   ;;  %457 = vperm.xlu1 (!%p293_p9), %714, %v454_v5   ;;  %p335_p11 = scmp.lt.s32.totalorder (!%p293_p9), %s753_s26, 1 }
  0x20   : > { %v344_v8 = vpack.c.bf16 (!%p293_p9), %v343_v7, %v342_v6  ;;  %642 = vmatprep.subr.bf16.mxu1 (!%p293_p9), %v771_v2  ;;  %644 = vmatprep.mubr.msk.bf16.mxu1 (!%p293_p9), %vm772_vm0, %v771_v2  ;;  %v345_v10 = vld [vmem:[%s929_s1] sm:$0xf] (!%p293_p9) }
  0x21   : > { %v453_v11 = vld [vmem:[%s933_s5] sm:$0xf] (!%p293_p9) }
  0x22   : > { %637 = vmatpush3.bf16.msra.mxu0 (!%p293_p9), %v344_v8  ;;  %v397_v22 = vld [vmem:[%s931_s3] sm:$0xf] (!%p293_p9) }
  0x23   : > { %648 = vmatprep.subr.bf16.mxu0 (!%p293_p9), %v771_v2  ;;  %402 = vperm.xlu0 (!%p293_p9), %713, %v399_v9  }
  0x24   : > { %s949_s27 = smov (!%p333_p10, %s757_s27), 1  ;;  %s951_s26 = smov (!%p335_p11, %s753_s26), 1 }
  0x25   : > { %639 = vmatmul.mubr.msk.bf16.vlgmr.msra.gmra.mrb[0].mxu0 %vm352_vm1, %v345_v10  ;;  %s623_s11 = sshll.u32 %s949_s27, 1 }
  0x26   : > { %649 = vmatpush3.bf16.msra.mxu0 %v344_v8  ;;  %650 = vmatprep.mubr.msk.bf16.mxu0 %vm772_vm0, %v771_v2  ;;  %s338_s12 = sadd.s32 %s623_s11, %s951_s26 }
  0x27   : > { %s624_s13 = sshll.u32 %s338_s12, 3 }
  0x28   : > { %s340_s17 = scalar_lea.vmem %s935_s7, %s624_s13 }
  0x2d   : > { %651 = vmatmul.mubr.msk.bf16.vlgmr.msra.gmra.mrb[4].mxu0 %vm352_vm1, %v453_v11 }
  0x9e   : > { %v350_v12 = vpop.permute.xlu0 %349  ;;  %v458_v20 = vpop.permute.xlu1 %457 }
  0xa2   : > { %v403_v28 = vpop.permute.xlu0 %402 }
  0xf8   : > { %v390_v13 = vpop.f32.mrb[0].mxu0 }
  0xf9   : > { %v391_v14 = vadd.f32 %v390_v13, %v350_v12  ;;  %v640_v15 = vpop.f32.mrb[1].mxu0 }
  0xfa   : > { %v393_v16 = vpop.f32.mrb[2].mxu0 }
  0xfb   : > { %v396_v17 = vmax.f32 %v391_v14, 0.0  ;;  %v641_v18 = vpop.f32.mrb[3].mxu0 }
  0xfd   : > { %v398_v19 = vpack.c.bf16 %v396_v17, %v396_v17 }
  0xff   : > { %v411_v21 = vsel %vm409_vm2, %v398_v19, 0 }
 0x100   : > { %643 = vmatpush3.bf16.msra.mxu1 %v411_v21  ;;  %v497_v23 = vpop.f32.mrb[4].mxu0 }
 0x101   : > { %v498_v24 = vadd.f32 %v497_v23, %v458_v20  ;;  %v652_v25 = vpop.f32.mrb[5].mxu0 }
 0x102   : > { %v500_v26 = vpop.f32.mrb[6].mxu0 }
 0x103   : > { %645 = vmatmul.mubr.msk.bf16.vlgmr.msra.gmra.mrb[0].mxu1 %vm405_vm3, %v397_v22  ;;  %510 = vadd.xlane.f32.xlu0 %v498_v24  ;;  %v653_v27 = vpop.f32.mrb[7].mxu0 }
 0x190   : > { %v511_v29 = vpop.xlane.xlu0 %510 }
 0x191   : > { %v512_v30 = vmul.f32 0.0078125, %v511_v29 }
 0x193   : > { %v513_v31 = vsub.f32 %v498_v24, %v512_v30 }
 0x195   : > { %v514_v37 = vmul.f32 %v513_v31, %v513_v31 }
 0x1d6   : > { %v447_v32 = vpop.f32.mrb[0].mxu1 }
 0x1d7   : > { %v448_v33 = vadd.f32 %v447_v32, %v403_v28  ;;  %v646_v34 = vpop.f32.mrb[1].mxu1 }
 0x1d8   : > { %v450_v35 = vpop.f32.mrb[2].mxu1 }
 0x1d9   : > { %503 = vadd.xlane.f32.xlu1 %v448_v33  ;;  %v647_v36 = vpop.f32.mrb[3].mxu1 }
 0x1dd   : > { %515 = vadd.xlane.f32.xlu1 %v514_v37 }
 0x266   : > { %v504_v38 = vpop.xlane.xlu1 %503 }
 0x267   : > { %v505_v39 = vmul.f32 0.0078125, %v504_v38 }
 0x269   : > { %v506_v40 = vsub.f32 %v448_v33, %v505_v39 }
 0x26a   : > { %v516_v44 = vpop.xlane.xlu1 %515 }
 0x26b   : > { %v507_v41 = vmul.f32 %v506_v40, %v506_v40 }
 0x26d   : > { %508 = vadd.xlane.f32.xlu0 %v507_v41 }
 0x2fa   : > { %v509_v42 = vpop.xlane.xlu0 %508 }
 0x2fb   : > { %v518_v43 = vsel %vm517_vm4, %v504_v38, %v509_v42 }
 0x2fc   : > { %v520_v45 = vsel %vm519_vm5, %v518_v43, %v511_v29 }
 0x2fd   : > { %v522_v46 = vsel %vm521_vm6, %v520_v45, %v516_v44 }
 0x2fe   : > { %v524_v47 = vsel %vm523_vm7, %v522_v46, 0.0 }
 0x2ff   : > { %525 = vst.msk [vmem:[%s340_s17] sm:$0xff] %vm405_vm3, %v524_v47 }
 0x300 PF: > { %s17_s30 = sadd.s32 1, %s769_s30   ;;  %s936_s24 = smov %s749_s25 }
 0x301   : > { %p14_p12 = scmp.ge.s32.totalorder %s17_s30, 6   ;;  %s937_s25 = smov %s865_s14 }
 0x302   : > { %s938_s26 = smov %s761_s28  ;;  %s939_s27 = smov %s765_s29 }
 0x303   : > { %s940_s28 = smov %s943_s8  ;;  %s941_s29 = smov %s947_s9 }
 0x304   :  { %16 = sbr.rel (!%p14_p12) target bundleno = 4 (0x4), region = 121 }

// kernel: adapter_layer_forward.3
= control target key start
LH: loop header
LB: loop body
LE: loop exit
PB: predicated region body
PF: predicated region fallthrough
CT: control target
= control target key end

     0   :  { %s1073_s0 = inlined_call_operand.vmem [shape: f32[2,16,256], index: 0, kind: input, shape index: {}]   ;;  %s1074_s1 = inlined_call_operand.vmem [shape: bf16[8,16], index: 1, kind: input, shape index: {}]   ;;  %s1075_s2 = inlined_call_operand.vmem [shape: f32[8,1], index: 2, kind: input, shape index: {}]   ;;  %s1076_s3 = inlined_call_operand.vmem [shape: bf16[8,8], index: 3, kind: input, shape index: {}]   ;;  %s1077_s4 = inlined_call_operand.vmem [shape: f32[8,1], index: 4, kind: input, shape index: {}]   ;;  %s1078_s5 = inlined_call_operand.vmem [shape: bf16[8,16], index: 5, kind: input, shape index: {}]   ;;  %s1079_s6 = inlined_call_operand.vmem [shape: f32[8,1], index: 6, kind: input, shape index: {}]   ;;  %s1080_s7 = inlined_call_operand.vmem [shape: f32[8,1], index: 7, kind: input, shape index: {}]   ;;  %s1081_s8 = inlined_call_operand.vmem [shape: f32[8,1], index: 8, kind: input, shape index: {}]   ;;  %s1082_s9 = inlined_call_operand.vmem [shape: f32[8,1], index: 9, kind: input, shape index: {}]   ;;  %s1083_s10 = inlined_call_operand.vmem [shape: f32[8,1], index: 10, kind: input, shape index: {}]   ;;  %s1084_s11 = inlined_call_operand.vmem [shape: f32[2,8,256], index: 11, kind: output, shape index: {}]  }
   0x1   :  { %1086 = sst [smem:[#allocation4_spill]] %s1084_s11 }
   0x2   :  { %s949_s17 = smov 0   ;;  %s951_s18 = smov 0  }
   0x3   :  { %s953_s19 = smov 0   ;;  %s955_s20 = smov 0  }
   0x4   :  { %s957_s21 = smov 0   ;;  %s959_s22 = smov 0  }
   0x5   :  { %s961_s23 = smov 0  }
   0x6 LB: > { %s30_s24 = sadd.s32 1, %s876_s21  ;;  %s33_s25 = sadd.s32 1, %s880_s22  ;;  %s884_s23 = sphi %s961_s23, %s21_s23   ;;  %s880_s22 = sphi %s959_s22, %s1095_s22   ;;  %s876_s21 = sphi %s957_s21, %s1094_s21   ;;  %s872_s20 = sphi %s955_s20, %s1093_s20   ;;  %s868_s19 = sphi %s953_s19, %s1092_s19   ;;  %s864_s18 = sphi %s951_s18, %s1091_s18   ;;  %s860_s17 = sphi %s949_s17, %s1090_s17  }
   0x7   : > { %p31_p0 = scmp.ge.s32.totalorder %s30_s24, 2  ;;  %p49_p1 = scmp.ne.s32.totalorder %s864_s18, %s860_s17 }
   0x8   : > { %p50_p2 = scmp.eq.s32.totalorder %s884_s23, 0  ;;  %s42_s29 = sadd.s32 1, %s864_s18 }
   0x9   : > { %s1097_s24 = smov (%p31_p0, %s30_s24), 0  ;;  %s1099_s25 = smov (!%p31_p0, %s33_s25), %s880_s22 }
   0xa   : > { %1087 = sst [smem:[#allocation3_spill]] %s1097_s24  ;;  %p51_p3 = por %p50_p2, %p49_p1 }
   0xb   : > { %p35_p4 = scmp.ge.s32.totalorder %s1099_s25, 2  ;;  %s38_s26 = ssub.s32 %s876_s21, %s1097_s24 }
   0xc   : > { %p732_p6 = scmp.ge.s32.totalorder %s884_s23, 4 }
   0xd   : > { %s1101_s25 = smov (%p35_p4, %s1099_s25), 0 }
   0xe   : > { %s37_s27 = ssub.s32 %s880_s22, %s1101_s25  ;;  %343 = sbr.rel (%p732_p6) target bundleno = 28 (0x1c), region = 56 }
   0xf   : > { %s39_s28 = sor.u32 %s38_s26, %s37_s27 }
  0x10   : > { %p40_p5 = scmp.eq.s32.totalorder %s39_s28, 0 }
  0x12   : > { %s1000_s30 = scalar_select %p40_p5, %s864_s18, %s42_s29  }
  0x15   : > { %346 = sbr.rel (!%p51_p3) target bundleno = 28 (0x1c), region = 60  ;;  %s348_s12 = sand.u32 (%p51_p3), 1, %s864_s18  }
  0x16   : > { %s734_s13 = sshll.u32 (%p51_p3), %s880_s22, 2  ;;  %s733_s14 = sshll.u32 (%p51_p3), %s348_s12, 4 }
  0x17   : > { %s352_s15 = sadd.s32 (%p51_p3), %s876_s21, %s734_s13  ;;  %s350_s27 = scalar_lea.vmem (%p51_p3), [#allocation2], %s733_s14 }
  0x18   : > { %s735_s16 = sshll.u32 (%p51_p3), %s352_s15, 3 }
  0x19   : > { %s354_s26 = scalar_lea.vmem (%p51_p3), %s1073_s0, %s735_s16 }
  0x1a   : > { %v384_v0 = vld [vmem:[%s354_s26] sm:$0xff] (%p51_p3)  ;;  %v386_v1 = vld [vmem:[%s354_s26 + $0x10] sm:$0xff] (%p51_p3) }
  0x1b   : > { %385 = vst [vmem:[%s350_s27] sm:$0xff] (%p51_p3), %v384_v0  ;;  %387 = vst [vmem:[%s350_s27 + $0x8] sm:$0xff] (%p51_p3), %v386_v1 }
  0x1c PF: > { %p736_p7 = scmp.ge.s32.totalorder %s884_s23, 1  ;;  %p392_p8 = scmp.lt.s32.totalorder %s884_s23, 5 }
  0x1e   : > { %p393_p9 = pnand %p736_p7, %p392_p8 }
  0x1f   : > { %s399_s28 = sand.u32 (!%p393_p9), 1, %s860_s17   ;;  %v886_v2 = vmov (!%p393_p9), 0.0   ;;  %vm887_vm0 = vmmov (!%p393_p9), 0   ;;  %v454_v3 = vld [vmem:[%s1075_s2] sm:$0xff] (!%p393_p9)  ;;  %v888_v4 = vmov (!%p393_p9), 0   ;;  %vm460_vm1 = vcmask (!%p393_p9), 130048  }
  0x20   : > { %396 = sbr.rel (%p393_p9) target bundleno = 485 (0x1e5), region = 98  ;;  %751 = vmatprep.subr.bf16.mxu0 (!%p393_p9), %v886_v2  ;;  %s737_s29 = sshll.u32 (!%p393_p9), %s399_s28, 4  ;;  %753 = vmatprep.mubr.msk.bf16.mxu0 (!%p393_p9), %vm887_vm0, %v886_v2  ;;  %v507_v8 = vld [vmem:[%s1077_s4] sm:$0xff] (!%p393_p9)  ;;  %vm517_vm2 = vcmask (!%p393_p9), 1043456   ;;  %vm513_vm3 = vcmask (!%p393_p9), 64512  }
  0x21   : > { %828 = vset.pattern.permute.xlu0 (!%p393_p9), %v888_v4  ;;  %757 = vmatprep.subr.bf16.mxu1 (!%p393_p9), %v886_v2  ;;  %s401_s12 = scalar_lea.vmem (!%p393_p9), [#allocation2], %s737_s29  ;;  %v453_v9 = vld [vmem:[%s1074_s1] sm:$0xf] (!%p393_p9)  ;;  %p441_p10 = scmp.lt.s32.totalorder (!%p393_p9), %s872_s20, 1 }
  0x22   : > { %v450_v5 = vld [vmem:[%s401_s12] sm:$0xff] (!%p393_p9)  ;;  %v451_v6 = vld [vmem:[%s401_s12 + $0x8] sm:$0xff] (!%p393_p9)  ;;  %457 = vperm.xlu0 (!%p393_p9), %828, %v454_v3   ;;  %759 = vmatprep.mubr.msk.bf16.mxu1 (!%p393_p9), %vm887_vm0, %v886_v2  ;;  %p443_p11 = scmp.lt.s32.totalorder (!%p393_p9), %s868_s19, 1  ;;  %s1088_s12 = sld [smem:[#allocation4_spill]] (!%p393_p9) }
  0x23   : > { %v452_v7 = vpack.c.bf16 (!%p393_p9), %v451_v6, %v450_v5  ;;  %829 = vset.pattern.permute.xlu1 (!%p393_p9), %v888_v4  ;;  %v618_v10 = vld [vmem:[%s1081_s8] sm:$0xff] (!%p393_p9) }
  0x24   : > { %v633_v11 = vld [vmem:[%s1083_s10] sm:$0xff] (!%p393_p9) }
  0x25   : > { %752 = vmatpush3.bf16.msra.mxu0 (!%p393_p9), %v452_v7  ;;  %v561_v12 = vld [vmem:[%s1078_s5] sm:$0xf] (!%p393_p9) }
  0x26   : > { %510 = vperm.xlu0 (!%p393_p9), %828, %v507_v8   ;;  %763 = vmatprep.subr.bf16.mxu0 (!%p393_p9), %v886_v2  ;;  %v562_v13 = vld [vmem:[%s1079_s6] sm:$0xff] (!%p393_p9) }
  0x27   : > { %565 = vperm.xlu1 %829, %v562_v13   ;;  %v611_v14 = vld [vmem:[%s1080_s7] sm:$0xff]  ;;  %s1103_s20 = smov (!%p441_p10, %s872_s20), 1  ;;  %s1105_s19 = smov (!%p443_p11, %s868_s19), 1 }
  0x28   : > { %754 = vmatmul.mubr.msk.bf16.vlgmr.msra.gmra.mrb[0].mxu0 %vm460_vm1, %v453_v9  ;;  %v625_v15 = vld [vmem:[%s1082_s9] sm:$0xff]  ;;  %s738_s27 = sshll.u32 %s1103_s20, 1 }
  0x29   : > { %764 = vmatpush3.bf16.msra.mxu0 %v452_v7  ;;  %765 = vmatprep.mubr.msk.bf16.mxu0 %vm887_vm0, %v886_v2  ;;  %v505_v25 = vld [vmem:[%s1076_s3] sm:$0xf]  ;;  %s446_s28 = sadd.s32 %s738_s27, %s1105_s19 }
  0x2a   : > { %621 = vperm.xlu0 %828, %v618_v10   ;;  %s739_s29 = sshll.u32 %s446_s28, 3 }
  0x2b   : > { %614 = vperm.xlu1 %829, %v611_v14   ;;  %s448_s17 = scalar_lea.vmem %s1088_s12, %s739_s29 }
  0x2e   : > { %636 = vperm.xlu0 %828, %v633_v11  }
  0x2f   : > { %628 = vperm.xlu1 %829, %v625_v15  }
  0x30   : > { %766 = vmatmul.mubr.msk.bf16.vlgmr.msra.gmra.mrb[4].mxu0 %vm460_vm1, %v561_v12 }
  0xa1   : > { %v458_v16 = vpop.permute.xlu0 %457 }
  0xa5   : > { %v511_v31 = vpop.permute.xlu0 %510 }
  0xa6   : > { %v566_v30 = vpop.permute.xlu1 %565 }
  0xa9   : > { %v622_v34 = vpop.permute.xlu0 %621 }
  0xaa   : > { %v615_v32 = vpop.permute.xlu1 %614 }
  0xad   : > { %v637_v45 = vpop.permute.xlu0 %636 }
  0xae   : > { %v629_v38 = vpop.permute.xlu1 %628 }
  0xfb   : > { %v498_v17 = vpop.f32.mrb[0].mxu0 }
  0xfc   : > { %v499_v18 = vadd.f32 %v498_v17, %v458_v16  ;;  %v755_v19 = vpop.f32.mrb[1].mxu0 }
  0xfd   : > { %v501_v20 = vpop.f32.mrb[2].mxu0 }
  0xfe   : > { %v504_v21 = vmax.f32 %v499_v18, 0.0  ;;  %v756_v22 = vpop.f32.mrb[3].mxu0 }
 0x100   : > { %v506_v23 = vpack.c.bf16 %v504_v21, %v504_v21 }
 0x102   : > { %v519_v24 = vsel %vm517_vm2, %v506_v23, 0 }
 0x103   : > { %758 = vmatpush3.bf16.msra.mxu1 %v519_v24  ;;  %v605_v26 = vpop.f32.mrb[4].mxu0 }
 0x104   : > { %v767_v27 = vpop.f32.mrb[5].mxu0  ;;  %v606_v35 = vadd.f32 %v605_v26, %v566_v30 }
 0x105   : > { %v608_v28 = vpop.f32.mrb[6].mxu0 }
 0x106   : > { %760 = vmatmul.mubr.msk.bf16.vlgmr.msra.gmra.mrb[0].mxu1 %vm513_vm3, %v505_v25  ;;  %v768_v29 = vpop.f32.mrb[7].mxu0  ;;  %v631_v42 = vmul.f32 %v629_v38, %v606_v35 }
 0x1d9   : > { %v555_v33 = vpop.f32.mrb[0].mxu1 }
 0x1da   : > { %v556_v36 = vadd.f32 %v555_v33, %v511_v31  ;;  %v761_v37 = vpop.f32.mrb[1].mxu1 }
 0x1db   : > { %v558_v39 = vpop.f32.mrb[2].mxu1 }
 0x1dc   : > { %v617_v40 = vmul.f32 %v615_v32, %v556_v36  ;;  %v762_v41 = vpop.f32.mrb[3].mxu1 }
 0x1de   : > { %v624_v43 = vadd.f32 %v622_v34, %v617_v40 }
 0x1e0   : > { %v632_v44 = vadd.f32 %v631_v42, %v624_v43 }
 0x1e2   : > { %v639_v46 = vadd.f32 %v637_v45, %v632_v44 }
 0x1e4   : > { %640 = vst [vmem:[%s448_s17] sm:$0xff] %v639_v46 }
 0x1e5 PF: > { %s21_s23 = sadd.s32 1, %s884_s23   ;;  %s1089_s13 = sld [smem:[#allocation3_spill]] }
 0x1e6   : > { %p18_p12 = scmp.ge.s32.totalorder %s21_s23, 6   ;;  %s1090_s17 = smov %s864_s18 }
 0x1e7   : > { %s1091_s18 = smov %s1000_s30  ;;  %s1092_s19 = smov %s876_s21 }
 0x1e8   : > { %s1093_s20 = smov %s880_s22  ;;  %s1095_s22 = smov %s1101_s25 }
 0x1e9   :  { %20 = sbr.rel (!%p18_p12) target bundleno = 6 (0x6), region = 137 }
 0x1eb   : > { %s1094_s21 = smov %s1089_s13 }

</bundles_post_ra>
